<compile_context>
chip_gen: v5e
topology: v5e:2x2
jax: 0.10.0
libtpu: 0.0.40
codegen_flags: <defaults>
</compile_context>

<pallas_src>
import jax
import jax.numpy as jnp
from jax import lax
from jax.experimental import pallas as pl
from jax.experimental.pallas import tpu as pltpu

_LANE = 128
_SUBLANE = 8


def tower_kernel(x_ref, w1_ref, b1_ref, w2_ref, b2_ref, w3t_ref, b3t_ref, o_ref):
    # Layer 1: Linear + ReLU   (Dropout = identity in eval).  K = true din.
    h = jnp.dot(x_ref[...], w1_ref[...], preferred_element_type=jnp.float32)
    h = jnp.maximum(h + b1_ref[...], 0.0)
    # Layer 2: Linear + ReLU   (Dropout = identity in eval)
    h = jnp.dot(h, w2_ref[...], preferred_element_type=jnp.float32)
    h = jnp.maximum(h + b2_ref[...], 0.0)
    # Output layer, computed transposed so the batch tile lands on the lane
    # axis of the output block: (out_dim, tm) = w3t (out_dim, H2) . h (tm, H2)^T
    out_t = lax.dot_general(
        w3t_ref[...], h,
        dimension_numbers=(((1,), (1,)), ((), ())),
        preferred_element_type=jnp.float32,
    )
    o_ref[...] = (out_t + b3t_ref[...]).astype(o_ref.dtype)


def _round_up(x, m):
    return (x + m - 1) // m * m


def _choose_tm(batch, block_m):
    """Largest batch tile <= block_m, keeping >=2 grid steps once batch >= 256
    (so v7x's two TensorCores both get work) and keeping the output block's
    last dim a multiple of 128 (or equal to the full padded batch)."""
    if batch < 2 * _LANE:
        return _round_up(batch, _SUBLANE)          # single tile covers whole batch
    half = (batch + 1) // 2
    return max(_LANE, min(block_m, _round_up(half, _LANE)))


def prepare_tower_params(params, compute_dtype=jnp.float32):
    """One-time (hoisted out of the per-call path) padding / transposition of
    the tower parameters.  Only hidden/output dims are lane-padded; the input
    feature dim (K of the first matmul) is left at its true size."""
    w1, b1 = params["w1"], params["b1"]
    w2, b2 = params["w2"], params["b2"]
    w3, b3 = params["w3"], params["b3"]

    din, h1 = w1.shape
    h2, dout = w2.shape[1], w3.shape[1]
    h1_p, h2_p = _round_up(h1, _LANE), _round_up(h2, _LANE)

    prep = {
        "w1": jnp.pad(w1, ((0, 0), (0, h1_p - h1))).astype(compute_dtype),
        "b1": jnp.pad(b1, ((0, 0), (0, h1_p - h1))).astype(jnp.float32),
        "w2": jnp.pad(w2, ((0, h1_p - h1), (0, h2_p - h2))).astype(compute_dtype),
        "b2": jnp.pad(b2, ((0, 0), (0, h2_p - h2))).astype(jnp.float32),
        "w3t": jnp.pad(w3.T, ((0, 0), (0, h2_p - h2))).astype(compute_dtype),  # (dout, h2_p)
        "b3t": b3.reshape(dout, 1).astype(jnp.float32),
        "dims": (din, h1_p, h2_p, dout),
    }
    return jax.tree_util.tree_map(lambda a: a, prep)


def tower_network(x, prep, *, block_m=512, x_dtype=None):
    """x: (batch, input_dim) float32.  prep: output of prepare_tower_params."""
    din, h1_p, h2_p, dout = prep["dims"]
    batch, din_x = x.shape
    assert din_x == din, (din_x, din)

    if x_dtype is not None:           # optional streamed-byte reduction (e.g. bf16)
        x = x.astype(x_dtype)

    tm = _choose_tm(batch, block_m)
    batch_p = _round_up(batch, tm)
    if batch_p != batch:
        # Row-independent network: padded rows never contaminate valid rows and
        # are sliced off below.  This pad is a no-op when batch % tm == 0.
        x = jnp.pad(x, ((0, batch_p - batch), (0, 0)))

    grid = (batch_p // tm,)

    def const_spec(shape):
        # Constant block index -> tile stays VMEM-resident across grid steps.
        return pl.BlockSpec(shape, lambda i: (0,) * len(shape))

    out_t = pl.pallas_call(
        tower_kernel,
        out_shape=jax.ShapeDtypeStruct((dout, batch_p), jnp.float32),
        grid=grid,
        in_specs=[
            # x streamed per batch tile; last block dim == full array dim (no lane pad).
            pl.BlockSpec((tm, din), lambda i: (i, 0)),
            const_spec((din, h1_p)),
            const_spec((1, h1_p)),
            const_spec((h1_p, h2_p)),
            const_spec((1, h2_p)),
            const_spec((dout, h2_p)),
            const_spec((dout, 1)),
        ],
        out_specs=pl.BlockSpec((dout, tm), lambda i: (0, i)),
        compiler_params=pltpu.CompilerParams(
            dimension_semantics=("parallel",),     # batch tiles shard across TCs on v7x
            vmem_limit_bytes=32 * 1024 * 1024,     # usage is ~1 MiB even at tm=1024
        ),
    )(x, prep["w1"], prep["b1"], prep["w2"], prep["b2"], prep["w3t"], prep["b3t"])

    # (out_dim, batch_p) -> (batch, out_dim); free reshape for out_dim == 1.
    return out_t[:, :batch].T


def init_params(key, input_dim, hidden_dims, output_dim):
    """Deterministic init mimicking PyTorch nn.Linear default (U[-1/sqrt(fan_in), +])."""
    params = {}
    dims = [input_dim] + list(hidden_dims) + [output_dim]
    for i in range(len(dims) - 1):
        fan_in, fan_out = dims[i], dims[i + 1]
        key, kw, kb = jax.random.split(key, 3)
        bound = 1.0 / jnp.sqrt(jnp.float32(fan_in))
        # stored as (in_dim, out_dim) so the kernel does x @ W (== x @ W_torch.T)
        params[f"w{i + 1}"] = jax.random.uniform(
            kw, (fan_in, fan_out), jnp.float32, -bound, bound)
        params[f"b{i + 1}"] = jax.random.uniform(
            kb, (1, fan_out), jnp.float32, -bound, bound)
    return params


def tower_reference(x, params):
    """Plain-JAX reference for sanity checking."""
    h = jnp.maximum(x @ params["w1"] + params["b1"], 0.0)
    h = jnp.maximum(h @ params["w2"] + params["b2"], 0.0)
    return h @ params["w3"] + params["b3"]


if __name__ == "__main__":
    batch = 256                 # exercises batch tiling: tm=128 -> grid=(2,)
    input_dim = 32
    tower_hidden_dims = [64, 32]
    output_dim = 1

    key = jax.random.PRNGKey(0)
    key, kx = jax.random.split(key)
    x = jax.random.normal(kx, (batch, input_dim), jnp.float32)
    params = init_params(key, input_dim, tower_hidden_dims, output_dim)

    # One-time parameter prep (padding / transpose hoisted out of the per-call path).
    prep = prepare_tower_params(params)

    fwd = jax.jit(lambda xx: tower_network(xx, prep))
    out = jax.block_until_ready(fwd(x))
    ref = tower_reference(x, params)

    assert out.shape == (batch, output_dim), out.shape
    assert jnp.allclose(out, ref, atol=1e-5, rtol=1e-5), float(jnp.max(jnp.abs(out - ref)))

    print("KERNEL_OK")
</pallas_src>

<mosaic_0001>
module attributes {stable_mosaic.version = 11 : i64} {
  func.func @tower_kernel(%arg0: i32, %arg1: memref<128x32xf32, #tpu.memory_space<vmem>>, %arg2: memref<32x128xf32, #tpu.memory_space<vmem>>, %arg3: memref<1x128xf32, #tpu.memory_space<vmem>>, %arg4: memref<128x128xf32, #tpu.memory_space<vmem>>, %arg5: memref<1x128xf32, #tpu.memory_space<vmem>>, %arg6: memref<1x128xf32, #tpu.memory_space<vmem>>, %arg7: memref<1x1xf32, #tpu.memory_space<vmem>>, %arg8: memref<1x128xf32, #tpu.memory_space<vmem>>) attributes {dimension_semantics = [#tpu.dimension_semantics<parallel>], iteration_bounds = array<i64: 2>, scalar_prefetch = 0 : i64, scratch_operands = 0 : i64, tpu.core_type = #tpu.core_type<tc>, window_params = [{transform_indices = @transform_0, window_bounds = array<i64: 128, 32>}, {pipeline_mode = #tpu.pipeline_mode<synchronous>, transform_indices = @transform_1, window_bounds = array<i64: 32, 128>}, {pipeline_mode = #tpu.pipeline_mode<synchronous>, transform_indices = @transform_2, window_bounds = array<i64: 1, 128>}, {pipeline_mode = #tpu.pipeline_mode<synchronous>, transform_indices = @transform_3, window_bounds = array<i64: 128, 128>}, {pipeline_mode = #tpu.pipeline_mode<synchronous>, transform_indices = @transform_4, window_bounds = array<i64: 1, 128>}, {pipeline_mode = #tpu.pipeline_mode<synchronous>, transform_indices = @transform_5, window_bounds = array<i64: 1, 128>}, {pipeline_mode = #tpu.pipeline_mode<synchronous>, transform_indices = @transform_6, window_bounds = array<i64: 1, 1>}, {transform_indices = @transform_7, window_bounds = array<i64: 1, 128>}]} {
    %c0 = arith.constant 0 : index
    %c0_0 = arith.constant 0 : index
    %0 = vector.load %arg1[%c0, %c0_0] : memref<128x32xf32, #tpu.memory_space<vmem>>, vector<128x32xf32>
    %c0_1 = arith.constant 0 : index
    %c0_2 = arith.constant 0 : index
    %1 = vector.load %arg2[%c0_1, %c0_2] : memref<32x128xf32, #tpu.memory_space<vmem>>, vector<32x128xf32>
    %cst = arith.constant dense<0.000000e+00> : vector<128x128xf32>
    %2 = tpu.matmul %0, %1, %cst {dimension_numbers = #tpu.dot_dimension_numbers<[1], [0], [0], [1], [0, 0, 1, 1], [], []>} : vector<128x32xf32>, vector<32x128xf32>, vector<128x128xf32> -> vector<128x128xf32>
    %c0_3 = arith.constant 0 : index
    %c0_4 = arith.constant 0 : index
    %3 = vector.load %arg3[%c0_3, %c0_4] : memref<1x128xf32, #tpu.memory_space<vmem>>, vector<1x128xf32>
    %4 = vector.broadcast %3 : vector<1x128xf32> to vector<128x128xf32>
    %5 = arith.addf %2, %4 : vector<128x128xf32>
    %cst_5 = arith.constant 0.000000e+00 : f32
    %6 = vector.broadcast %cst_5 : f32 to vector<128x128xf32>
    %7 = arith.maximumf %5, %6 : vector<128x128xf32>
    %c0_6 = arith.constant 0 : index
    %c0_7 = arith.constant 0 : index
    %8 = vector.load %arg4[%c0_6, %c0_7] : memref<128x128xf32, #tpu.memory_space<vmem>>, vector<128x128xf32>
    %cst_8 = arith.constant dense<0.000000e+00> : vector<128x128xf32>
    %9 = tpu.matmul %7, %8, %cst_8 {dimension_numbers = #tpu.dot_dimension_numbers<[1], [0], [0], [1], [0, 0, 1, 1], [], []>} : vector<128x128xf32>, vector<128x128xf32>, vector<128x128xf32> -> vector<128x128xf32>
    %c0_9 = arith.constant 0 : index
    %c0_10 = arith.constant 0 : index
    %10 = vector.load %arg5[%c0_9, %c0_10] : memref<1x128xf32, #tpu.memory_space<vmem>>, vector<1x128xf32>
    %11 = vector.broadcast %10 : vector<1x128xf32> to vector<128x128xf32>
    %12 = arith.addf %9, %11 : vector<128x128xf32>
    %cst_11 = arith.constant 0.000000e+00 : f32
    %13 = vector.broadcast %cst_11 : f32 to vector<128x128xf32>
    %14 = arith.maximumf %12, %13 : vector<128x128xf32>
    %c0_12 = arith.constant 0 : index
    %c0_13 = arith.constant 0 : index
    %15 = vector.load %arg6[%c0_12, %c0_13] : memref<1x128xf32, #tpu.memory_space<vmem>>, vector<1x128xf32>
    %cst_14 = arith.constant dense<0.000000e+00> : vector<1x128xf32>
    %16 = tpu.matmul %15, %14, %cst_14 {dimension_numbers = #tpu.dot_dimension_numbers<[1], [1], [0], [0], [0, 0, 1, 0], [], []>} : vector<1x128xf32>, vector<128x128xf32>, vector<1x128xf32> -> vector<1x128xf32>
    %c0_15 = arith.constant 0 : index
    %c0_16 = arith.constant 0 : index
    %17 = vector.load %arg7[%c0_15, %c0_16] : memref<1x1xf32, #tpu.memory_space<vmem>>, vector<1x1xf32>
    %18 = vector.broadcast %17 : vector<1x1xf32> to vector<1x128xf32>
    %19 = arith.addf %16, %18 : vector<1x128xf32>
    %c0_17 = arith.constant 0 : index
    %c0_18 = arith.constant 0 : index
    %20 = vector.load %arg8[%c0_17, %c0_18] : memref<1x128xf32, #tpu.memory_space<vmem>>, vector<1x128xf32>
    tpu.vector_store %arg8[%c0_17, %c0_18], %19 {strides = array<i32>} : memref<1x128xf32, #tpu.memory_space<vmem>>, vector<1x128xf32>,
    return
  }
  func.func @transform_0(%arg0: i32) -> (i32, i32) {
    %c0_i32 = arith.constant 0 : i32
    %c0_i32_0 = arith.constant 0 : i32
    return %arg0, %c0_i32 : i32, i32
  }
  func.func @transform_1(%arg0: i32) -> (i32, i32) {
    %c0_i32 = arith.constant 0 : i32
    %c0_i32_0 = arith.constant 0 : i32
    %c0_i32_1 = arith.constant 0 : i32
    return %c0_i32, %c0_i32_0 : i32, i32
  }
  func.func @transform_2(%arg0: i32) -> (i32, i32) {
    %c0_i32 = arith.constant 0 : i32
    %c0_i32_0 = arith.constant 0 : i32
    %c0_i32_1 = arith.constant 0 : i32
    return %c0_i32, %c0_i32_0 : i32, i32
  }
  func.func @transform_3(%arg0: i32) -> (i32, i32) {
    %c0_i32 = arith.constant 0 : i32
    %c0_i32_0 = arith.constant 0 : i32
    %c0_i32_1 = arith.constant 0 : i32
    return %c0_i32, %c0_i32_0 : i32, i32
  }
  func.func @transform_4(%arg0: i32) -> (i32, i32) {
    %c0_i32 = arith.constant 0 : i32
    %c0_i32_0 = arith.constant 0 : i32
    %c0_i32_1 = arith.constant 0 : i32
    return %c0_i32, %c0_i32_0 : i32, i32
  }
  func.func @transform_5(%arg0: i32) -> (i32, i32) {
    %c0_i32 = arith.constant 0 : i32
    %c0_i32_0 = arith.constant 0 : i32
    %c0_i32_1 = arith.constant 0 : i32
    return %c0_i32, %c0_i32_0 : i32, i32
  }
  func.func @transform_6(%arg0: i32) -> (i32, i32) {
    %c0_i32 = arith.constant 0 : i32
    %c0_i32_0 = arith.constant 0 : i32
    %c0_i32_1 = arith.constant 0 : i32
    return %c0_i32, %c0_i32_0 : i32, i32
  }
  func.func @transform_7(%arg0: i32) -> (i32, i32) {
    %c0_i32 = arith.constant 0 : i32
    %c0_i32_0 = arith.constant 0 : i32
    return %c0_i32, %arg0 : i32, i32
  }
}

</mosaic_0001>

<bundles_post_ra>
// kernel: _lambda_.1
= control target key start
LH: loop header
LB: loop body
LE: loop exit
PB: predicated region body
PF: predicated region fallthrough
CT: control target
= control target key end

     0   :  { %s1013_s0 = inlined_call_operand.vmem [shape: f32[256,32], index: 0, kind: input, shape index: {}]   ;;  %s1014_s1 = inlined_call_operand.vmem [shape: f32[32,128], index: 1, kind: input, shape index: {}]   ;;  %s1015_s2 = inlined_call_operand.vmem [shape: f32[1,128], index: 2, kind: input, shape index: {}]   ;;  %s1016_s3 = inlined_call_operand.vmem [shape: f32[128,128], index: 3, kind: input, shape index: {}]   ;;  %s1017_s4 = inlined_call_operand.vmem [shape: f32[1,128], index: 4, kind: input, shape index: {}]   ;;  %s1018_s5 = inlined_call_operand.vmem [shape: f32[1,128], index: 5, kind: input, shape index: {}]   ;;  %s1019_s6 = inlined_call_operand.<no memory space> [shape: f32[1,1], index: 6, kind: input, shape index: {}]   ;;  %s1020_s7 = inlined_call_operand.hbm [shape: f32[1,256], index: 7, kind: output, shape index: {}]  }
   0x1   :  { %v12_v0 = vstv %s1019_s6 }
   0x2   :  { %13 = vst [vmem:[#allocation2] sm:$0x1] %v12_v0 }
   0x3   :  { %14 = vsyncpa [#allocation4], 0 }
   0x4   :  { %16 = vsyncpa [#allocation4 + $0x1], 0  ;;  %s823_s26 = smov 0   ;;  %s825_s27 = smov 0  }
   0x5   :  { %s827_s28 = smov 0   ;;  %s829_s29 = smov 0  }
   0x6 LB: > { %s844_s6 = sadd.s32 4294967295, %s777_s29   ;;  %s632_s30 = sadd.s32 4294967294, %s777_s29   ;;  %s777_s29 = sphi %s829_s29, %s1026_s29   ;;  %s773_s28 = sphi %s827_s28, %s1025_s28   ;;  %s769_s27 = sphi %s825_s27, %s1024_s27   ;;  %s765_s26 = sphi %s823_s26, %s1023_s26  }
   0x7   : > { %s848_s8 = sadd.s32 1, %s777_s29   ;;  %s181_s9 = sadd.s32 1, %s773_s28 }
   0x8   : > { %s178_s10 = ssub.s32 %s777_s29, %s848_s8  ;;  %p191_p0 = scmp.ne.s32.totalorder %s773_s28, %s769_s27 }
   0x9   : > { %p179_p1 = scmp.eq.s32.totalorder %s178_s10, 0  ;;  %p192_p2 = scmp.eq.s32.totalorder %s844_s6, 1 }
   0xa   : > { %p197_p3 = scmp.ne.s32.totalorder %s769_s27, %s765_s26  ;;  %p198_p4 = scmp.eq.s32.totalorder %s632_s30, 1 }
   0xb   : > { %s859_s11 = scalar_select %p179_p1, %s773_s28, %s181_s9  }
   0xc   : > { %p861_p5 = por %p192_p2, %p191_p0  ;;  %p865_p6 = por %p198_p4, %p197_p3 }
   0xd   : > { %p635_p7 = scmp.ge.s32.totalorder %s777_s29, 1  ;;  %p243_p8 = scmp.lt.s32.totalorder %s777_s29, 3 }
   0xf   : > { %p244_p9 = pnand %p635_p7, %p243_p8 }
  0x10   : > { %s636_s18 = sshll.u32 (!%p244_p9), %s844_s6, 4  ;;  %s272_s21 = sand.u32 (!%p244_p9), 1, %s769_s27  }
  0x11   : > { %247 = sbr.rel (%p244_p9) target bundleno = 616 (0x268), region = 48  ;;  %p275_p10 = scmp.lt.s32.totalorder (!%p244_p9), %s636_s18, 31 }
  0x12   : > { %s573_s24 = scalar_lea.hbm (!%p244_p9), %s1020_s7, %s844_s6  ;;  %s273_s25 = scalar_lea.vmem (!%p244_p9), [#allocation3], %s272_s21 }
  0x13   : > { %s575_s9 = sshll.u32 (!%p244_p9), %s273_s25, 4  ;;  %s577_s10 = sshll.u32 (!%p244_p9), %s573_s24, 4  ;;  %s576_s9 = int_to_ptr.vmem [resolvable:$true] %s575_s9  ;;  %s578_s10 = int_to_ptr.hbm [resolvable:$true] %s577_s10 }
  0x14   : > { %s565_s14 = scalar_lea.sflag (!%p244_p9), [#allocation4], %s272_s21  ;;  %s729_s15 = sshra.s32 (!%p244_p9), %s578_s10, 4  ;;  %s730_s15 = int_to_ptr.hbm [resolvable:$true] %s729_s15 }
  0x15   : > { %s731_s16 = scalar_lea.hbm (!%p244_p9), %s730_s15, 1  ;;  %s735_s6 = scalar_lea.hbm (!%p244_p9), %s1020_s7, 2 }
  0x16   : > { %v299_v1 = vld [vmem:[%s1014_s1 + $0x18] sm:$0xff]  ;;  %v298_v2 = vld [vmem:[%s1014_s1 + $0x10] sm:$0xff]  ;;  %v297_v3 = vld [vmem:[%s1014_s1 + $0x8] sm:$0xff]  ;;  %s1028_s18 = smov (!%p275_p10, %s636_s18), 31  ;;  %vm304_vm0 = vcmask 261120   ;;  %p732_p11 = scmp.ne.s32.totalorder %s730_s15, %s731_s16 }
  0x17   : > { %365 = vmatpush.msra.mxu0 %v299_v1  ;;  %v296_v4 = vld [vmem:[%s1014_s1] sm:$0xff]  ;;  %s637_s23 = sshll.u32 %s1028_s18, 3  ;;  %v449_v14 = vld [vmem:[%s1016_s3 + $0x78] sm:$0xff]  ;;  %v448_v15 = vld [vmem:[%s1016_s3 + $0x70] sm:$0xff]  ;;  %p736_p0 = scmp.lt.s32.totalorder %s730_s15, %s1020_s7 }
  0x18   : > { %s887_s30 = scalar_lea.vmem %s1013_s0, %s637_s23  ;;  %454 = vmatpush.msra.mxu1 %v449_v14  ;;  %656 = vmatpush.msra.mxu3 %v449_v14  ;;  %v447_v16 = vld [vmem:[%s1016_s3 + $0x68] sm:$0xff]  ;;  %v446_v18 = vld [vmem:[%s1016_s3 + $0x60] sm:$0xff]  ;;  %v445_v19 = vld [vmem:[%s1016_s3 + $0x58] sm:$0xff]  ;;  %p733_p12 = pnand %p732_p11, %p861_p5 }
  0x19   : > { %366 = vmatpush.msra.mxu0 %v298_v2  ;;  %v280_v5 = vld [vmem:[%s887_s30] sm:$0xff]  ;;  %v281_v6 = vld [vmem:[%s887_s30 + $0x8] sm:$0xff]  ;;  %v282_v7 = vld [vmem:[%s887_s30 + $0x10] sm:$0xff]  ;;  %p737_p1 = scmp.lt.s32.totalorder %s735_s6, %s731_s16 }
  0x1a   : > { %v283_v8 = vld [vmem:[%s887_s30 + $0x18] sm:$0xff]  ;;  %v284_v9 = vld [vmem:[%s887_s30 + $0x20] sm:$0xff]  ;;  %v285_v10 = vld [vmem:[%s887_s30 + $0x28] sm:$0xff]  ;;  %455 = vmatpush.msra.mxu1 %v448_v15  ;;  %657 = vmatpush.msra.mxu3 %v448_v15  ;;  %p734_p13 = pneg %p733_p12 }
  0x1b   : > { %367 = vmatpush.msra.mxu0 %v297_v3  ;;  %v286_v11 = vld [vmem:[%s887_s30 + $0x30] sm:$0xff]  ;;  %v287_v12 = vld [vmem:[%s887_s30 + $0x38] sm:$0xff]  ;;  %v288_v13 = vld [vmem:[%s887_s30 + $0x40] sm:$0xff]  ;;  %p738_p2 = por %p737_p1, %p736_p0 }
  0x1c   : > { %v289_v17 = vld [vmem:[%s887_s30 + $0x48] sm:$0xff]  ;;  %456 = vmatpush.msra.mxu1 %v447_v16  ;;  %658 = vmatpush.msra.mxu3 %v447_v16  ;;  %v444_v20 = vld [vmem:[%s1016_s3 + $0x50] sm:$0xff]  ;;  %v442_v23 = vld [vmem:[%s1016_s3 + $0x40] sm:$0xff] }
  0x1d   : > { %368 = vmatpush.msra.mxu0 %v296_v4  ;;  %v443_v21 = vld [vmem:[%s1016_s3 + $0x48] sm:$0xff]  ;;  %v290_v22 = vld [vmem:[%s887_s30 + $0x50] sm:$0xff]  ;;  %v441_v24 = vld [vmem:[%s1016_s3 + $0x38] sm:$0xff]  ;;  %p739_p3 = pnand %p738_p2, %p734_p13 }
  0x1e   : > { %638 = vmatmul.msk.f32.vlgmr.msra.gmra.mxu0 %vm304_vm0, %v280_v5  ;;  %457 = vmatpush.msra.mxu1 %v446_v18  ;;  %v440_v25 = vld [vmem:[%s1016_s3 + $0x30] sm:$0xff]  ;;  %v439_v26 = vld [vmem:[%s1016_s3 + $0x28] sm:$0xff]  ;;  %v291_v27 = vld [vmem:[%s887_s30 + $0x58] sm:$0xff] }
  0x1f   : > { %659 = vmatpush.msra.mxu3 %v446_v18  ;;  %v438_v28 = vld [vmem:[%s1016_s3 + $0x20] sm:$0xff]  ;;  %v437_v29 = vld [vmem:[%s1016_s3 + $0x18] sm:$0xff]  ;;  %v436_v30 = vld [vmem:[%s1016_s3 + $0x10] sm:$0xff] }
  0x20   : > { %458 = vmatpush.msra.mxu1 %v445_v19  ;;  %v292_v31 = vld [vmem:[%s887_s30 + $0x60] sm:$0xff]  ;;  %v435_v32 = vld [vmem:[%s1016_s3 + $0x8] sm:$0xff]  ;;  %v294_v35 = vld [vmem:[%s887_s30 + $0x70] sm:$0xff] }
  0x21   : > { %660 = vmatpush.msra.mxu3 %v445_v19  ;;  %v434_v33 = vld [vmem:[%s1016_s3] sm:$0xff]  ;;  %v293_v34 = vld [vmem:[%s887_s30 + $0x68] sm:$0xff]  ;;  %v295_v36 = vld [vmem:[%s887_s30 + $0x78] sm:$0xff] }
  0x22   : > { %459 = vmatpush.msra.mxu1 %v444_v20  ;;  %v713_v37 = vld [vmem:[%s1015_s2] ss:$0 sm:$0xff] }
  0x23   : > { %661 = vmatpush.msra.mxu3 %v444_v20 }
  0x24   : > { %460 = vmatpush.msra.mxu1 %v443_v21 }
  0x25   : > { %662 = vmatpush.msra.mxu3 %v443_v21 }
  0x26   : > { %639 = vmatmul.msk.f32.gmra.mxu0 %vm304_vm0, %v281_v6  ;;  %461 = vmatpush.msra.mxu1 %v442_v23 }
  0x27   : > { %663 = vmatpush.msra.mxu3 %v442_v23 }
  0x28   : > { %462 = vmatpush.msra.mxu1 %v441_v24 }
  0x29   : > { %664 = vmatpush.msra.mxu3 %v441_v24 }
  0x2a   : > { %463 = vmatpush.msra.mxu1 %v440_v25 }
  0x2b   : > { %665 = vmatpush.msra.mxu3 %v440_v25 }
  0x2c   : > { %464 = vmatpush.msra.mxu1 %v439_v26 }
  0x2d   : > { %666 = vmatpush.msra.mxu3 %v439_v26 }
  0x2e   : > { %640 = vmatmul.msk.f32.gmra.mxu0 %vm304_vm0, %v282_v7  ;;  %465 = vmatpush.msra.mxu1 %v438_v28 }
  0x2f   : > { %667 = vmatpush.msra.mxu3 %v438_v28 }
  0x30   : > { %466 = vmatpush.msra.mxu1 %v437_v29 }
  0x31   : > { %668 = vmatpush.msra.mxu3 %v437_v29 }
  0x32   : > { %467 = vmatpush.msra.mxu1 %v436_v30 }
  0x33   : > { %669 = vmatpush.msra.mxu3 %v436_v30 }
  0x34   : > { %468 = vmatpush.msra.mxu1 %v435_v32 }
  0x35   : > { %670 = vmatpush.msra.mxu3 %v435_v32 }
  0x36   : > { %641 = vmatmul.msk.f32.gmra.mxu0 %vm304_vm0, %v283_v8  ;;  %469 = vmatpush.msra.mxu1 %v434_v33 }
  0x37   : > { %671 = vmatpush.msra.mxu3 %v434_v33 }
  0x3e   : > { %642 = vmatmul.msk.f32.gmra.mxu0 %vm304_vm0, %v284_v9 }
  0x46   : > { %643 = vmatmul.msk.f32.gmra.mxu0 %vm304_vm0, %v285_v10 }
  0x4e   : > { %644 = vmatmul.msk.f32.gmra.mxu0 %vm304_vm0, %v286_v11 }
  0x56   : > { %645 = vmatmul.msk.f32.gmra.mxu0 %vm304_vm0, %v287_v12 }
  0x5e   : > { %646 = vmatmul.msk.f32.gmra.mxu0 %vm304_vm0, %v288_v13 }
  0x66   : > { %647 = vmatmul.msk.f32.gmra.mxu0 %vm304_vm0, %v289_v17 }
  0x6e   : > { %648 = vmatmul.msk.f32.gmra.mxu0 %vm304_vm0, %v290_v22 }
  0x76   : > { %649 = vmatmul.msk.f32.gmra.mxu0 %vm304_vm0, %v291_v27 }
  0x7e   : > { %650 = vmatmul.msk.f32.gmra.mxu0 %vm304_vm0, %v292_v31 }
  0x86   : > { %651 = vmatmul.msk.f32.gmra.mxu0 %vm304_vm0, %v293_v34  ;;  %v714_v34 = vld [vmem:[%s1017_s4] ss:$0 sm:$0xff] }
  0x8e   : > { %652 = vmatmul.msk.f32.gmra.mxu0 %vm304_vm0, %v294_v35 }
  0x96   : > { %653 = vmatmul.msk.f32.gmra.mxu0 %vm304_vm0, %v295_v36 }
  0x9b   : > { %v370_v38 = vpop.f32.mrf.mxu0 }
  0x9c   : > { %v371_v39 = vadd.f32 %v713_v37, %v370_v38 }
  0x9e   : > { %v418_v40 = vmax.f32 %v371_v39, 0.0 }
  0xa0   : > { %470 = vmatmul.f32.vlgmr.msra.gmra.mxu1 %v418_v40 }
  0xa3   : > { %v373_v41 = vpop.f32.mrf.mxu0 }
  0xa4   : > { %v374_v42 = vadd.f32 %v713_v37, %v373_v41 }
  0xa6   : > { %v419_v43 = vmax.f32 %v374_v42, 0.0 }
  0xa8   : > { %473 = vmatmul.f32.gmra.mxu1 %v419_v43 }
  0xab   : > { %v376_v44 = vpop.f32.mrf.mxu0 }
  0xac   : > { %v377_v45 = vadd.f32 %v713_v37, %v376_v44 }
  0xae   : > { %v420_v46 = vmax.f32 %v377_v45, 0.0 }
  0xb0   : > { %476 = vmatmul.f32.gmra.mxu1 %v420_v46 }
  0xb3   : > { %v379_v47 = vpop.f32.mrf.mxu0 }
  0xb4   : > { %v380_v48 = vadd.f32 %v713_v37, %v379_v47 }
  0xb6   : > { %v421_v49 = vmax.f32 %v380_v48, 0.0 }
  0xb8   : > { %479 = vmatmul.f32.gmra.mxu1 %v421_v49 }
  0xbb   : > { %v382_v50 = vpop.f32.mrf.mxu0 }
  0xbc   : > { %v383_v51 = vadd.f32 %v713_v37, %v382_v50 }
  0xbe   : > { %v422_v52 = vmax.f32 %v383_v51, 0.0 }
  0xc0   : > { %482 = vmatmul.f32.gmra.mxu1 %v422_v52 }
  0xc3   : > { %v385_v53 = vpop.f32.mrf.mxu0 }
  0xc4   : > { %v386_v54 = vadd.f32 %v713_v37, %v385_v53 }
  0xc6   : > { %v423_v55 = vmax.f32 %v386_v54, 0.0 }
  0xc8   : > { %485 = vmatmul.f32.gmra.mxu1 %v423_v55 }
  0xcb   : > { %v388_v56 = vpop.f32.mrf.mxu0 }
  0xcc   : > { %v389_v57 = vadd.f32 %v713_v37, %v388_v56 }
  0xce   : > { %v424_v58 = vmax.f32 %v389_v57, 0.0 }
  0xd0   : > { %488 = vmatmul.f32.gmra.mxu1 %v424_v58  ;;  %v536_v58 = vld [vmem:[#allocation2] sm:$0x1] }
  0xd3   : > { %v391_v59 = vpop.f32.mrf.mxu0 }
  0xd4   : > { %v392_v60 = vadd.f32 %v713_v37, %v391_v59  ;;  %v779_v59 = vmov 0  }
  0xd5   : > { %712 = vset.pattern.permute.xlu0 %v779_v59 }
  0xd6   : > { %v425_v61 = vmax.f32 %v392_v60, 0.0  ;;  %539 = vperm.xlu0 %712, %v536_v58  }
  0xd8   : > { %491 = vmatmul.f32.gmra.mxu1 %v425_v61 }
  0xdb   : > { %v394_v62 = vpop.f32.mrf.mxu0 }
  0xdc   : > { %v395_v63 = vadd.f32 %v713_v37, %v394_v62 }
  0xde   : > { %v426_v0 = vmax.f32 %v395_v63, 0.0 }
  0xe0   : > { %494 = vmatmul.f32.gmra.mxu1 %v426_v0 }
  0xe3   : > { %v397_v1 = vpop.f32.mrf.mxu0 }
  0xe4   : > { %v398_v2 = vadd.f32 %v713_v37, %v397_v1 }
  0xe6   : > { %v427_v3 = vmax.f32 %v398_v2, 0.0 }
  0xe8   : > { %497 = vmatmul.f32.vlgmr.msra.gmra.mxu3 %v427_v3 }
  0xeb   : > { %v400_v4 = vpop.f32.mrf.mxu0 }
  0xec   : > { %v401_v5 = vadd.f32 %v713_v37, %v400_v4 }
  0xee   : > { %v428_v6 = vmax.f32 %v401_v5, 0.0 }
  0xf0   : > { %500 = vmatmul.f32.gmra.mxu3 %v428_v6 }
  0xf3   : > { %v403_v7 = vpop.f32.mrf.mxu0 }
  0xf4   : > { %v404_v8 = vadd.f32 %v713_v37, %v403_v7 }
  0xf6   : > { %v429_v9 = vmax.f32 %v404_v8, 0.0 }
  0xf8   : > { %503 = vmatmul.f32.gmra.mxu3 %v429_v9  ;;  %v535_v9 = vld [vmem:[%s1018_s5] sm:$0x1] }
  0xfb   : > { %v406_v10 = vpop.f32.mrf.mxu0 }
  0xfc   : > { %v407_v11 = vadd.f32 %v713_v37, %v406_v10 }
  0xfe   : > { %v430_v12 = vmax.f32 %v407_v11, 0.0 }
 0x100   : > { %506 = vmatmul.f32.gmra.mxu3 %v430_v12 }
 0x103   : > { %v409_v13 = vpop.f32.mrf.mxu0 }
 0x104   : > { %v410_v14 = vadd.f32 %v713_v37, %v409_v13 }
 0x106   : > { %v431_v15 = vmax.f32 %v410_v14, 0.0 }
 0x108   : > { %509 = vmatmul.f32.gmra.mxu3 %v431_v15 }
 0x10b   : > { %v412_v16 = vpop.f32.mrf.mxu0 }
 0x10c   : > { %v413_v17 = vadd.f32 %v713_v37, %v412_v16 }
 0x10e   : > { %v432_v18 = vmax.f32 %v413_v17, 0.0 }
 0x110   : > { %512 = vmatmul.f32.gmra.mxu3 %v432_v18 }
 0x113   : > { %v415_v19 = vpop.f32.mrf.mxu0 }
 0x114   : > { %v416_v20 = vadd.f32 %v713_v37, %v415_v19 }
 0x116   : > { %v433_v21 = vmax.f32 %v416_v20, 0.0 }
 0x118   : > { %515 = vmatmul.f32.gmra.mxu3 %v433_v21 }
 0x11d   : > { %v972_v22 = vpop.f32.mrf.mxu1 }
 0x11e   : > { %v472_v6 = vadd.f32 %v714_v34, %v972_v22 }
 0x120   : > { %v519_v8 = vmax.f32 %v472_v6, 0.0 }
 0x125   : > { %v474_v24 = vpop.f32.mrf.mxu1 }
 0x126   : > { %v475_v4 = vadd.f32 %v714_v34, %v474_v24 }
 0x128   : > { %v520_v7 = vmax.f32 %v475_v4, 0.0 }
 0x12d   : > { %v477_v26 = vpop.f32.mrf.mxu1 }
 0x12e   : > { %v478_v2 = vadd.f32 %v714_v34, %v477_v26 }
 0x130   : > { %v521_v5 = vmax.f32 %v478_v2, 0.0 }
 0x135   : > { %v480_v28 = vpop.f32.mrf.mxu1 }
 0x136   : > { %v481_v0 = vadd.f32 %v714_v34, %v480_v28 }
 0x138   : > { %v522_v3 = vmax.f32 %v481_v0, 0.0 }
 0x13d   : > { %v483_v30 = vpop.f32.mrf.mxu1 }
 0x13e   : > { %v484_v62 = vadd.f32 %v714_v34, %v483_v30 }
 0x140   : > { %v523_v1 = vmax.f32 %v484_v62, 0.0 }
 0x145   : > { %v486_v33 = vpop.f32.mrf.mxu1 }
 0x146   : > { %v487_v60 = vadd.f32 %v714_v34, %v486_v33 }
 0x148   : > { %v524_v63 = vmax.f32 %v487_v60, 0.0  ;;  %v540_v10 = vpop.permute.xlu0 %539 }
 0x149   : > { %v542_v11 = vperm.slane %v540_v10, 0 }
 0x14d   : > { %v489_v39 = vpop.f32.mrf.mxu1 }
 0x14e   : > { %v490_v56 = vadd.f32 %v714_v34, %v489_v39 }
 0x150   : > { %v525_v61 = vmax.f32 %v490_v56, 0.0 }
 0x155   : > { %v492_v44 = vpop.f32.mrf.mxu1 }
 0x156   : > { %v493_v54 = vadd.f32 %v714_v34, %v492_v44 }
 0x158   : > { %v526_v57 = vmax.f32 %v493_v54, 0.0 }
 0x15d   : > { %v495_v51 = vpop.f32.mrf.mxu1 }
 0x15e   : > { %v496_v52 = vadd.f32 %v714_v34, %v495_v51 }
 0x160   : > { %v527_v55 = vmax.f32 %v496_v52, 0.0 }
 0x16b   : > { %v498_v23 = vpop.f32.mrf.mxu3 }
 0x16c   : > { %v499_v49 = vadd.f32 %v714_v34, %v498_v23 }
 0x16e   : > { %v528_v53 = vmax.f32 %v499_v49, 0.0 }
 0x173   : > { %v501_v25 = vpop.f32.mrf.mxu3 }
 0x174   : > { %v502_v47 = vadd.f32 %v714_v34, %v501_v25 }
 0x176   : > { %v529_v50 = vmax.f32 %v502_v47, 0.0 }
 0x17b   : > { %v504_v27 = vpop.f32.mrf.mxu3 }
 0x17c   : > { %v505_v45 = vadd.f32 %v714_v34, %v504_v27 }
 0x17e   : > { %v530_v48 = vmax.f32 %v505_v45, 0.0 }
 0x183   : > { %v507_v29 = vpop.f32.mrf.mxu3 }
 0x184   : > { %v508_v42 = vadd.f32 %v714_v34, %v507_v29 }
 0x186   : > { %v531_v46 = vmax.f32 %v508_v42, 0.0 }
 0x18b   : > { %v510_v31 = vpop.f32.mrf.mxu3 }
 0x18c   : > { %v511_v40 = vadd.f32 %v714_v34, %v510_v31 }
 0x18e   : > { %v532_v43 = vmax.f32 %v511_v40, 0.0 }
 0x193   : > { %v513_v32 = vpop.f32.mrf.mxu3 }
 0x194   : > { %v514_v37 = vadd.f32 %v714_v34, %v513_v32 }
 0x196   : > { %v533_v41 = vmax.f32 %v514_v37, 0.0 }
 0x19b   : > { %v516_v35 = vpop.f32.mrf.mxu3 }
 0x19c   : > { %v517_v36 = vadd.f32 %v714_v34, %v516_v35 }
 0x19e   : > { %v534_v38 = vmax.f32 %v517_v36, 0.0 }
 0x1a0   : > { %543 = vmatpush.xpose.msra.mxu2 %v534_v38 }
 0x1a4   : > { %544 = vmatpush.xpose.msra.mxu2 %v533_v41 }
 0x1a8   : > { %545 = vmatpush.xpose.msra.mxu2 %v532_v43 }
 0x1ac   : > { %546 = vmatpush.xpose.msra.mxu2 %v531_v46 }
 0x1b0   : > { %547 = vmatpush.xpose.msra.mxu2 %v530_v48 }
 0x1b4   : > { %548 = vmatpush.xpose.msra.mxu2 %v529_v50 }
 0x1b8   : > { %549 = vmatpush.xpose.msra.mxu2 %v528_v53 }
 0x1bc   : > { %550 = vmatpush.xpose.msra.mxu2 %v527_v55 }
 0x1c0   : > { %551 = vmatpush.xpose.msra.mxu2 %v526_v57 }
 0x1c4   : > { %552 = vmatpush.xpose.msra.mxu2 %v525_v61 }
 0x1c8   : > { %553 = vmatpush.xpose.msra.mxu2 %v524_v63 }
 0x1cc   : > { %554 = vmatpush.xpose.msra.mxu2 %v523_v1 }
 0x1d0   : > { %555 = vmatpush.xpose.msra.mxu2 %v522_v3 }
 0x1d4   : > { %556 = vmatpush.xpose.msra.mxu2 %v521_v5 }
 0x1d8   : > { %557 = vmatpush.xpose.msra.mxu2 %v520_v7 }
 0x1dc   : > { %558 = vmatpush.xpose.msra.mxu2 %v519_v8 }
 0x1df   : > { %559 = vmatmul.f32.vlgmr.msra.gmra.mxu2 %v535_v9 }
 0x262   : > { %v560_v12 = vpop.f32.mrf.mxu2 }
 0x263   : > { %v561_v13 = vadd.f32 %v560_v12, %v542_v11 }
 0x265   : > { %563 = vst [vmem:[%s273_s25] sm:$0x1] %v561_v13 }
 0x266   : > { %742 = shalt.err (!%p739_p3)
}
 0x267   : > { %672 = dma.vmem_to_hbm [thread:$0]  (%p861_p5), %s576_s9, 16, %s578_s10, %s565_s14  }
 0x268 PF: > { %p678_p4 = scmp.ge.s32.totalorder %s777_s29, 2  ;;  %s589_s20 = sand.u32 1, %s765_s26  }
 0x269   : > { %s590_s21 = scalar_lea.sflag [#allocation4], %s589_s20 }
 0x26a   : > { %p675_p7 = pnand %p678_p4, %p865_p6 }
 0x26c   : > { %p676_p8 = pneg %p675_p7 }
 0x26e   : > { %760 = dma.done.wait (%p676_p8), %s590_s21, 16  }
 0x26f   : > { %762 = vsyncadd (%p676_p8), %s590_s21, 4294967280  ;;  %p19_p9 = scmp.ge.s32.totalorder %s848_s8, 4   ;;  %s1023_s26 = smov %s769_s27 }
 0x270   : > { %s1024_s27 = smov %s773_s28  ;;  %s1025_s28 = smov %s859_s11 }
 0x271   : > { %s1026_s29 = smov %s848_s8  ;;  %21 = sbr.rel (!%p19_p9) target bundleno = 6 (0x6), region = 83 }
 0x276   :  { %595 = vsyncpa [#allocation4], 1 }
 0x277   :  { %597 = vsyncpa [#allocation4 + $0x1], 1 }

</bundles_post_ra>
